<compile_context>
chip_gen: v7x
topology: tpu7x:2x2x1
jax: 0.10.0
libtpu: 0.0.40
codegen_flags: <defaults>
</compile_context>

<pallas_src>
import functools

import jax
import jax.numpy as jnp
from jax.experimental import pallas as pl
from jax.experimental.pallas import tpu as pltpu

LANE = 128
SUBLANE = 8
ROW_ALIGN = 16  # bf16 packs 16 rows per sublane group


def _round_up(x, m):
    return (x + m - 1) // m * m


def _silu(x):
    return x * jax.nn.sigmoid(x)


def _pad2(a, rows, cols):
    pr, pc = rows - a.shape[0], cols - a.shape[1]
    if pr == 0 and pc == 0:
        return a
    return jnp.pad(a, ((0, pr), (0, pc)))


def _vmem_limit_bytes():
    # Generation-aware: ~capacity - 8 MiB headroom, capped at 112 MiB.
    #   v5e/v6e (128 MiB physical) -> 112 MiB; v7x (64 MiB) -> 56 MiB.
    try:
        cap = int(pltpu.get_tpu_info().vmem_capacity_bytes)
    except Exception:  # e.g. interpret mode / CPU tracing
        cap = 64 * 1024 * 1024
    return int(min(112 * 1024 * 1024, max(cap - 8 * 1024 * 1024, 32 * 1024 * 1024)))


# ----------------------------- Pallas kernel ------------------------------

def _mlp_kernel(x_ref, w1_ref, b1_ref, w2_ref, b2_ref, w3_ref, b3_ref,
                o_ref, h_ref, *, n1_chunk):
    # Matmuls in the storage dtype (bf16 MXU path), f32 accumulation.
    # Bias/SiLU epilogues in f32 (VPU/EUP; v5e has no bf16 VPU path).
    mxu_dtype = x_ref.dtype
    x = x_ref[...]
    d_h = w1_ref.shape[1]

    # Layer 1, chunked along N: SiLU + downcast of chunk j overlaps the MXU on
    # chunk j+1; f32 intermediate bounded to (tm, n1_chunk).  Static trip
    # count -> constant slices (no dynamic lane indexing).
    for j in range(d_h // n1_chunk):
        c0 = j * n1_chunk
        h = jnp.dot(x, w1_ref[:, c0:c0 + n1_chunk],
                    preferred_element_type=jnp.float32)
        h = _silu(h + b1_ref[:, c0:c0 + n1_chunk].astype(jnp.float32))
        h_ref[:, c0:c0 + n1_chunk] = h.astype(h_ref.dtype)

    # Layers 2 + 3 off the bf16 scratch.
    # TODO(synk): for very large d_hidden (weights > ~40 MiB bf16) also K/N
    # chunk layers 2/3 and tile the weights over a grid axis on v7x.
    h1 = h_ref[...]
    h2 = jnp.dot(h1, w2_ref[...], preferred_element_type=jnp.float32)
    h2 = _silu(h2 + b2_ref[...].astype(jnp.float32))

    out = jnp.dot(h2.astype(mxu_dtype), w3_ref[...],
                  preferred_element_type=jnp.float32)
    out = out + b3_ref[...].astype(jnp.float32)
    o_ref[...] = out.astype(o_ref.dtype)


def mlp_pallas(tokens, w1, b1, w2, b2, w3, b3, *, tm=256):
    """tokens: (M, d_in). Weights stored (in, out); biases (1, out).

    d_hidden / d_out must already be padded to multiples of 128 (lane-dense);
    d_in may be arbitrary (the token block spans the full K dim).  Rows are
    padded to the tile here (and sliced off on return if padding was needed).
    """
    M, d_in = tokens.shape
    d_h = w1.shape[1]
    d_out = w3.shape[1]
    assert w1.shape[0] == d_in and w2.shape == (d_h, d_h) and w3.shape[0] == d_h
    assert d_h % LANE == 0 and d_out % LANE == 0

    # Row tile: big (amortizes ~0.35us/grid step, fills MXU rows), multiple of
    # 16 for bf16 packing, shrunk for small M, and capped so the "parallel"
    # row axis has >= 2 blocks when M >= 256 (v7x has 2 TensorCores).
    tm = min(tm, _round_up(M, ROW_ALIGN))
    if M >= 2 * 128:
        tm = min(tm, _round_up(pl.cdiv(_round_up(M, ROW_ALIGN), 2), ROW_ALIGN))
    m_pad = _round_up(M, tm)
    if m_pad != M:
        tokens = jnp.pad(tokens, ((0, m_pad - M), (0, 0)))  # sliced off below

    grid = (m_pad // tm,)

    # Layer-1 N chunk size (multiple of 128, divides d_h).
    if d_h <= 512:
        n1_chunk = d_h
    elif d_h % 512 == 0:
        n1_chunk = 512
    elif d_h % 256 == 0:
        n1_chunk = 256
    else:
        n1_chunk = 128

    row_map = lambda i: (i, 0)
    rep_map = lambda i: (0, 0)   # grid-invariant block: stays resident in VMEM

    def resident(shape):
        # Single-buffered: no point double-buffering a block whose index never
        # changes; halves resident-weight VMEM.
        return pl.BlockSpec(shape, rep_map, pipeline_mode=pl.Buffered(1))

    itemsize = jnp.dtype(tokens.dtype).itemsize
    cost = pl.CostEstimate(
        flops=2 * m_pad * (d_in * d_h + d_h * d_h + d_h * d_out),
        transcendentals=2 * m_pad * d_h,
        bytes_accessed=itemsize * (m_pad * (d_in + d_out)
                                   + d_in * d_h + d_h * d_h + d_h * d_out
                                   + 2 * d_h + d_out),
    )

    out = pl.pallas_call(
        functools.partial(_mlp_kernel, n1_chunk=n1_chunk),
        out_shape=jax.ShapeDtypeStruct((m_pad, d_out), tokens.dtype),
        grid_spec=pltpu.PrefetchScalarGridSpec(
            num_scalar_prefetch=0,
            grid=grid,
            in_specs=[
                pl.BlockSpec((tm, d_in), row_map),   # token row tile (double-buffered)
                resident((d_in, d_h)),               # W1
                resident((1, d_h)),                  # b1
                resident((d_h, d_h)),                # W2
                resident((1, d_h)),                  # b2
                resident((d_h, d_out)),              # W3
                resident((1, d_out)),                # b3
            ],
            out_specs=pl.BlockSpec((tm, d_out), row_map),
            scratch_shapes=[pltpu.VMEM((tm, d_h), tokens.dtype)],
        ),
        compiler_params=pltpu.CompilerParams(
            dimension_semantics=("parallel",),        # row tiles across TCs (v7x)
            vmem_limit_bytes=_vmem_limit_bytes(),
        ),
        cost_estimate=cost,
    )(tokens, w1, b1, w2, b2, w3, b3)

    return out[:M] if m_pad != M else out


# ----------------------------- Module wrapper -----------------------------

def vision_projector_forward(x, params, select_features,
                             compute_dtype=jnp.bfloat16, tm=256):
    """x: [B, C, H, W] (NCHW, like the PyTorch module)."""
    B, C, H, W = x.shape
    assert H % 2 == 0 and W % 2 == 0
    c = select_features
    h, w = H // 2, W // 2

    # Patchify: rearrange 'b c (h ph) (w pw) -> b (h w) (ph pw c)', ph=pw=2.
    # Pure index shuffle kept in XLA (not a rectangular BlockSpec tiling).
    # TODO(synk): fold the 2x2 patchify gather into the kernel's input DMA
    # (NHWC upstream + custom index_map / manual strided copy) to remove this
    # HBM round trip.
    xs = x[:, :c].reshape(B, c, h, 2, w, 2)
    xs = jnp.transpose(xs, (0, 2, 4, 3, 5, 1))               # b h w ph pw c
    tokens = xs.reshape(B * h * w, 4 * c).astype(compute_dtype)

    d_in, d_h = params["w1"].shape
    d_out = params["w3"].shape[1]
    # d_in stays unpadded (token block spans the full K dim -> no extra HBM
    # round trip rewriting the token matrix); only a cheap one-time sublane
    # pad when d_in % 8 != 0.  Hidden/out dims are lane-padded (weights only +
    # lane-dense output stores); zero padding is exact.
    d_in_p = d_in if d_in % SUBLANE == 0 else _round_up(d_in, SUBLANE)
    d_h_p = _round_up(d_h, LANE)
    d_out_p = _round_up(d_out, LANE)

    if d_in_p != d_in:
        tokens = _pad2(tokens, tokens.shape[0], d_in_p)

    w1 = _pad2(params["w1"].astype(compute_dtype), d_in_p, d_h_p)
    b1 = _pad2(params["b1"].astype(compute_dtype), 1, d_h_p)
    w2 = _pad2(params["w2"].astype(compute_dtype), d_h_p, d_h_p)
    b2 = _pad2(params["b2"].astype(compute_dtype), 1, d_h_p)
    w3 = _pad2(params["w3"].astype(compute_dtype), d_h_p, d_out_p)
    b3 = _pad2(params["b3"].astype(compute_dtype), 1, d_out_p)

    out = mlp_pallas(tokens, w1, b1, w2, b2, w3, b3, tm=tm)
    if d_out_p != d_out:
        out = out[:, :d_out]
    return out.reshape(B, h * w, d_out)


def init_params(key, d_in, d_hidden, d_out, dtype=jnp.float32):
    ks = jax.random.split(key, 6)
    s1 = 1.0 / jnp.sqrt(d_in)
    s2 = 1.0 / jnp.sqrt(d_hidden)
    return {
        "w1": jax.random.normal(ks[0], (d_in, d_hidden), dtype) * s1,
        "b1": jax.random.normal(ks[1], (1, d_hidden), dtype) * s1,
        "w2": jax.random.normal(ks[2], (d_hidden, d_hidden), dtype) * s2,
        "b2": jax.random.normal(ks[3], (1, d_hidden), dtype) * s2,
        "w3": jax.random.normal(ks[4], (d_hidden, d_out), dtype) * s2,
        "b3": jax.random.normal(ks[5], (1, d_out), dtype) * s2,
    }


# ------------------------------- Reference --------------------------------

def vision_projector_ref(x, params, select_features, compute_dtype=jnp.bfloat16):
    """Pure-JAX reference using the same precision recipe as the kernel."""
    B, C, H, W = x.shape
    c = select_features
    h, w = H // 2, W // 2
    xs = x[:, :c].reshape(B, c, h, 2, w, 2)
    t = jnp.transpose(xs, (0, 2, 4, 3, 5, 1)).reshape(B, h * w, 4 * c)
    t = t.astype(compute_dtype)

    def dense(a, wn, bn):
        wq = params[wn].astype(compute_dtype)
        bq = params[bn].astype(compute_dtype).astype(jnp.float32)
        return jnp.dot(a, wq, preferred_element_type=jnp.float32) + bq

    y = _silu(dense(t, "w1", "b1")).astype(compute_dtype)
    y = _silu(dense(y, "w2", "b2")).astype(compute_dtype)
    y = dense(y, "w3", "b3")
    return y.astype(compute_dtype)


# --------------------------------- Main ------------------------------------

if __name__ == "__main__":
    key = jax.random.PRNGKey(0)
    kx, kp = jax.random.split(key)

    # Small shapes consistent with the module:
    #   in_features = 4, select_features = 4, image 16x16 -> 128 tokens of dim 16
    B, C, H, W = 2, 4, 16, 16
    select_features = 4
    hidden_features = 32
    out_features = 32
    d_in = select_features * 4

    x = jax.random.normal(kx, (B, C, H, W), jnp.float32)
    params = init_params(kp, d_in, hidden_features, out_features)

    fwd = jax.jit(functools.partial(vision_projector_forward,
                                    select_features=select_features))
    out = jax.block_until_ready(fwd(x, params))

    ref = vision_projector_ref(x, params, select_features)

    assert out.shape == (B, (H // 2) * (W // 2), out_features), out.shape
    out_f = out.astype(jnp.float32)
    ref_f = ref.astype(jnp.float32)
    max_err = float(jnp.max(jnp.abs(out_f - ref_f)))
    assert jnp.allclose(out_f, ref_f, atol=3e-2, rtol=3e-2), max_err

    print("KERNEL_OK")
</pallas_src>

<mosaic_0001>
module attributes {stable_mosaic.version = 11 : i64} {
  func.func @_mlp_kernel(%arg0: i32, %arg1: memref<128x16xbf16, #tpu.memory_space<vmem>>, %arg2: memref<16x128xbf16, #tpu.memory_space<vmem>>, %arg3: memref<1x128xbf16, #tpu.memory_space<vmem>>, %arg4: memref<128x128xbf16, #tpu.memory_space<vmem>>, %arg5: memref<1x128xbf16, #tpu.memory_space<vmem>>, %arg6: memref<128x128xbf16, #tpu.memory_space<vmem>>, %arg7: memref<1x128xbf16, #tpu.memory_space<vmem>>, %arg8: memref<128x128xbf16, #tpu.memory_space<vmem>>, %arg9: memref<128x128xbf16, #tpu.memory_space<vmem>>) attributes {dimension_semantics = [#tpu.dimension_semantics<parallel>], iteration_bounds = array<i64: 1>, scalar_prefetch = 0 : i64, scratch_operands = 1 : i64, tpu.core_type = #tpu.core_type<tc>, window_params = [{transform_indices = @transform_0, window_bounds = array<i64: 128, 16>}, {pipeline_mode = #tpu.pipeline_mode<synchronous>, transform_indices = @transform_1, window_bounds = array<i64: 16, 128>}, {pipeline_mode = #tpu.pipeline_mode<synchronous>, transform_indices = @transform_2, window_bounds = array<i64: 1, 128>}, {pipeline_mode = #tpu.pipeline_mode<synchronous>, transform_indices = @transform_3, window_bounds = array<i64: 128, 128>}, {pipeline_mode = #tpu.pipeline_mode<synchronous>, transform_indices = @transform_4, window_bounds = array<i64: 1, 128>}, {pipeline_mode = #tpu.pipeline_mode<synchronous>, transform_indices = @transform_5, window_bounds = array<i64: 128, 128>}, {pipeline_mode = #tpu.pipeline_mode<synchronous>, transform_indices = @transform_6, window_bounds = array<i64: 1, 128>}, {transform_indices = @transform_7, window_bounds = array<i64: 128, 128>}]} {
    %c0 = arith.constant 0 : index
    %c0_0 = arith.constant 0 : index
    %0 = vector.load %arg1[%c0, %c0_0] : memref<128x16xbf16, #tpu.memory_space<vmem>>, vector<128x16xbf16>
    %c0_1 = arith.constant 0 : index
    %c0_2 = arith.constant 0 : index
    %1 = vector.load %arg2[%c0_1, %c0_2] : memref<16x128xbf16, #tpu.memory_space<vmem>>, vector<16x128xbf16>
    %cst = arith.constant dense<0.000000e+00> : vector<128x128xf32>
    %2 = tpu.matmul %0, %1, %cst {dimension_numbers = #tpu.dot_dimension_numbers<[1], [0], [0], [1], [0, 0, 1, 1], [], []>} : vector<128x16xbf16>, vector<16x128xbf16>, vector<128x128xf32> -> vector<128x128xf32>
    %c0_3 = arith.constant 0 : index
    %c0_4 = arith.constant 0 : index
    %3 = vector.load %arg3[%c0_3, %c0_4] : memref<1x128xbf16, #tpu.memory_space<vmem>>, vector<1x128xbf16>
    %4 = arith.extf %3 : vector<1x128xbf16> to vector<1x128xf32>
    %5 = vector.broadcast %4 : vector<1x128xf32> to vector<128x128xf32>
    %6 = arith.addf %2, %5 : vector<128x128xf32>
    %7 = arith.negf %6 : vector<128x128xf32>
    %8 = math.exp %7 : vector<128x128xf32>
    %cst_5 = arith.constant 1.000000e+00 : f32
    %9 = vector.broadcast %cst_5 : f32 to vector<128x128xf32>
    %10 = arith.addf %9, %8 : vector<128x128xf32>
    %11 = arith.divf %9, %10 : vector<128x128xf32>
    %12 = arith.mulf %6, %11 : vector<128x128xf32>
    %13 = arith.truncf %12 : vector<128x128xf32> to vector<128x128xbf16>
    %c0_6 = arith.constant 0 : index
    %c0_7 = arith.constant 0 : index
    %14 = vector.load %arg9[%c0_6, %c0_7] : memref<128x128xbf16, #tpu.memory_space<vmem>>, vector<128x128xbf16>
    tpu.vector_store %arg9[%c0_6, %c0_7], %13 {strides = array<i32>} : memref<128x128xbf16, #tpu.memory_space<vmem>>, vector<128x128xbf16>,
    %c0_8 = arith.constant 0 : index
    %c0_9 = arith.constant 0 : index
    %15 = vector.load %arg9[%c0_8, %c0_9] : memref<128x128xbf16, #tpu.memory_space<vmem>>, vector<128x128xbf16>
    %c0_10 = arith.constant 0 : index
    %c0_11 = arith.constant 0 : index
    %16 = vector.load %arg4[%c0_10, %c0_11] : memref<128x128xbf16, #tpu.memory_space<vmem>>, vector<128x128xbf16>
    %cst_12 = arith.constant dense<0.000000e+00> : vector<128x128xf32>
    %17 = tpu.matmul %15, %16, %cst_12 {dimension_numbers = #tpu.dot_dimension_numbers<[1], [0], [0], [1], [0, 0, 1, 1], [], []>} : vector<128x128xbf16>, vector<128x128xbf16>, vector<128x128xf32> -> vector<128x128xf32>
    %c0_13 = arith.constant 0 : index
    %c0_14 = arith.constant 0 : index
    %18 = vector.load %arg5[%c0_13, %c0_14] : memref<1x128xbf16, #tpu.memory_space<vmem>>, vector<1x128xbf16>
    %19 = arith.extf %18 : vector<1x128xbf16> to vector<1x128xf32>
    %20 = vector.broadcast %19 : vector<1x128xf32> to vector<128x128xf32>
    %21 = arith.addf %17, %20 : vector<128x128xf32>
    %22 = arith.negf %21 : vector<128x128xf32>
    %23 = math.exp %22 : vector<128x128xf32>
    %cst_15 = arith.constant 1.000000e+00 : f32
    %24 = vector.broadcast %cst_15 : f32 to vector<128x128xf32>
    %25 = arith.addf %24, %23 : vector<128x128xf32>
    %26 = arith.divf %24, %25 : vector<128x128xf32>
    %27 = arith.mulf %21, %26 : vector<128x128xf32>
    %28 = arith.truncf %27 : vector<128x128xf32> to vector<128x128xbf16>
    %c0_16 = arith.constant 0 : index
    %c0_17 = arith.constant 0 : index
    %29 = vector.load %arg6[%c0_16, %c0_17] : memref<128x128xbf16, #tpu.memory_space<vmem>>, vector<128x128xbf16>
    %cst_18 = arith.constant dense<0.000000e+00> : vector<128x128xf32>
    %30 = tpu.matmul %28, %29, %cst_18 {dimension_numbers = #tpu.dot_dimension_numbers<[1], [0], [0], [1], [0, 0, 1, 1], [], []>} : vector<128x128xbf16>, vector<128x128xbf16>, vector<128x128xf32> -> vector<128x128xf32>
    %c0_19 = arith.constant 0 : index
    %c0_20 = arith.constant 0 : index
    %31 = vector.load %arg7[%c0_19, %c0_20] : memref<1x128xbf16, #tpu.memory_space<vmem>>, vector<1x128xbf16>
    %32 = arith.extf %31 : vector<1x128xbf16> to vector<1x128xf32>
    %33 = vector.broadcast %32 : vector<1x128xf32> to vector<128x128xf32>
    %34 = arith.addf %30, %33 : vector<128x128xf32>
    %35 = arith.truncf %34 : vector<128x128xf32> to vector<128x128xbf16>
    %c0_21 = arith.constant 0 : index
    %c0_22 = arith.constant 0 : index
    %36 = vector.load %arg8[%c0_21, %c0_22] : memref<128x128xbf16, #tpu.memory_space<vmem>>, vector<128x128xbf16>
    tpu.vector_store %arg8[%c0_21, %c0_22], %35 {strides = array<i32>} : memref<128x128xbf16, #tpu.memory_space<vmem>>, vector<128x128xbf16>,
    return
  }
  func.func @transform_0(%arg0: i32) -> (i32, i32) {
    %c0_i32 = arith.constant 0 : i32
    %c0_i32_0 = arith.constant 0 : i32
    return %arg0, %c0_i32 : i32, i32
  }
  func.func @transform_1(%arg0: i32) -> (i32, i32) {
    %c0_i32 = arith.constant 0 : i32
    %c0_i32_0 = arith.constant 0 : i32
    %c0_i32_1 = arith.constant 0 : i32
    return %c0_i32, %c0_i32_0 : i32, i32
  }
  func.func @transform_2(%arg0: i32) -> (i32, i32) {
    %c0_i32 = arith.constant 0 : i32
    %c0_i32_0 = arith.constant 0 : i32
    %c0_i32_1 = arith.constant 0 : i32
    return %c0_i32, %c0_i32_0 : i32, i32
  }
  func.func @transform_3(%arg0: i32) -> (i32, i32) {
    %c0_i32 = arith.constant 0 : i32
    %c0_i32_0 = arith.constant 0 : i32
    %c0_i32_1 = arith.constant 0 : i32
    return %c0_i32, %c0_i32_0 : i32, i32
  }
  func.func @transform_4(%arg0: i32) -> (i32, i32) {
    %c0_i32 = arith.constant 0 : i32
    %c0_i32_0 = arith.constant 0 : i32
    %c0_i32_1 = arith.constant 0 : i32
    return %c0_i32, %c0_i32_0 : i32, i32
  }
  func.func @transform_5(%arg0: i32) -> (i32, i32) {
    %c0_i32 = arith.constant 0 : i32
    %c0_i32_0 = arith.constant 0 : i32
    %c0_i32_1 = arith.constant 0 : i32
    return %c0_i32, %c0_i32_0 : i32, i32
  }
  func.func @transform_6(%arg0: i32) -> (i32, i32) {
    %c0_i32 = arith.constant 0 : i32
    %c0_i32_0 = arith.constant 0 : i32
    %c0_i32_1 = arith.constant 0 : i32
    return %c0_i32, %c0_i32_0 : i32, i32
  }
  func.func @transform_7(%arg0: i32) -> (i32, i32) {
    %c0_i32 = arith.constant 0 : i32
    %c0_i32_0 = arith.constant 0 : i32
    return %arg0, %c0_i32 : i32, i32
  }
}

</mosaic_0001>

<bundles_post_ra>
// kernel: vision_projector_forward.1
= control target key start
LH: loop header
LB: loop body
LE: loop exit
PB: predicated region body
PF: predicated region fallthrough
CT: control target
= control target key end

     0   :  { %vm97_vm0 = vcmask 130048   ;;  %v47_v17 = vlaneseq  ;;  %s1638_s1 = inlined_call_operand.vmem [shape: bf16[16,128], index: 1, kind: input, shape index: {}]   ;;  %s1639_s0 = inlined_call_operand.vmem [shape: bf16[128,16], index: 0, kind: input, shape index: {}]   ;;  %s1640_s3 = inlined_call_operand.vmem [shape: bf16[128,128], index: 3, kind: input, shape index: {}]   ;;  %s1641_s2 = inlined_call_operand.vmem [shape: bf16[1,128], index: 2, kind: input, shape index: {}]   ;;  %s1642_s5 = inlined_call_operand.vmem [shape: bf16[128,128], index: 5, kind: input, shape index: {}]   ;;  %s1643_s4 = inlined_call_operand.vmem [shape: bf16[1,128], index: 4, kind: input, shape index: {}]   ;;  %s1644_s6 = inlined_call_operand.vmem [shape: bf16[1,128], index: 6, kind: input, shape index: {}]   ;;  %s1645_s7 = inlined_call_operand.vmem [shape: bf16[128,128], index: 7, kind: output, shape index: {}]  }
   0x1   :  { %v1160_v0 = vld [vmem:[%s1638_s1] sm:$0xff]   ;;  %v1162_v2 = vld [vmem:[%s1639_s0 + $0x8] sm:$0xff]   ;;  %v1163_v3 = vld [vmem:[%s1639_s0 + $0x10] sm:$0xff]  }
   0x2   :  { %v1161_v1 = vld [vmem:[%s1639_s0] sm:$0xff]   ;;  %1078 = vmatprep.subr.bf16.mxu0 %v1160_v0  ;;  %v1164_v4 = vld [vmem:[%s1639_s0 + $0x18] sm:$0xff]   ;;  %v1166_v6 = vld [vmem:[%s1639_s0 + $0x28] sm:$0xff]   ;;  %v48_v18 = vshrl.u32 %v47_v17, 7 }
   0x3   :  { %1079 = vmatpush3.bf16.msra.mxu0 %v1160_v0  ;;  %1080 = vmatprep.mubr.msk.bf16.mxu0 %vm97_vm0, %v1161_v1  ;;  %v1165_v5 = vld [vmem:[%s1639_s0 + $0x20] sm:$0xff]   ;;  %v1167_v7 = vld [vmem:[%s1639_s0 + $0x30] sm:$0xff]   ;;  %v1168_v8 = vld [vmem:[%s1639_s0 + $0x38] sm:$0xff]  }
   0x4   :  { %v1169_v9 = vld [vmem:[%s1640_s3] sm:$0xff]   ;;  %v1170_v10 = vld [vmem:[%s1640_s3 + $0x8] sm:$0xff]   ;;  %v1171_v11 = vld [vmem:[%s1640_s3 + $0x10] sm:$0xff]   ;;  %v1415_v21 = vsub.s32 0, %v48_v18 }
   0x5   :  { %1096 = vmatprep.subr.bf16.mxu1 %v1169_v9  ;;  %v1172_v12 = vld [vmem:[%s1640_s3 + $0x18] sm:$0xff]   ;;  %v1173_v13 = vld [vmem:[%s1640_s3 + $0x20] sm:$0xff]   ;;  %v1174_v14 = vld [vmem:[%s1640_s3 + $0x28] sm:$0xff]  }
   0x6   :  { %1081 = vmatmul.mubr.msk.bf16.vlgmr.msra.gmra.mrb[0].mxu0 %vm97_vm0, %v1162_v2  ;;  %1097 = vmatpush3.bf16.msra.mxu1 %v1169_v9  ;;  %v1175_v15 = vld [vmem:[%s1640_s3 + $0x30] sm:$0xff]   ;;  %v1176_v16 = vld [vmem:[%s1640_s3 + $0x38] sm:$0xff]   ;;  %v45_v19 = vld [vmem:[%s1641_s2] sm:$0x1] }
   0x7   :  { %1084 = vmatprep.mubr.msk.bf16.mxu0 %vm97_vm0, %v1163_v3  ;;  %1098 = vmatprep.subr.bf16.mxu1 %v1170_v10  ;;  %v46_v20 = vunpack.c.l.bf16 %v45_v19 }
   0x9   :  { %v1418_v22 = vrot.slane %v46_v20, %v1415_v21 }
   0xa   :  { %1099 = vmatpush3.bf16.msra.mxu1 %v1170_v10 }
   0xb   :  { %1100 = vmatprep.subr.bf16.mxu1 %v1171_v11 }
   0xe   :  { %1085 = vmatmul.mubr.msk.bf16.gmra.mrb[4].mxu0 %vm97_vm0, %v1164_v4  ;;  %1101 = vmatpush3.bf16.msra.mxu1 %v1171_v11 }
   0xf   :  { %1088 = vmatprep.mubr.msk.bf16.mxu0 %vm97_vm0, %v1165_v5  ;;  %1102 = vmatprep.subr.bf16.mxu1 %v1172_v12 }
  0x12   :  { %1103 = vmatpush3.bf16.msra.mxu1 %v1172_v12 }
  0x13   :  { %1104 = vmatprep.subr.bf16.mxu1 %v1173_v13 }
  0x16   :  { %1089 = vmatmul.mubr.msk.bf16.gmra.mrb[8].mxu0 %vm97_vm0, %v1166_v6  ;;  %1105 = vmatpush3.bf16.msra.mxu1 %v1173_v13 }
  0x17   :  { %1092 = vmatprep.mubr.msk.bf16.mxu0 %vm97_vm0, %v1167_v7  ;;  %1106 = vmatprep.subr.bf16.mxu1 %v1174_v14 }
  0x1a   :  { %1107 = vmatpush3.bf16.msra.mxu1 %v1174_v14 }
  0x1b   :  { %1108 = vmatprep.subr.bf16.mxu1 %v1175_v15 }
  0x1e   :  { %1093 = vmatmul.mubr.msk.bf16.gmra.mrb[12].mxu0 %vm97_vm0, %v1168_v8  ;;  %1109 = vmatpush3.bf16.msra.mxu1 %v1175_v15 }
  0x1f   :  { %1110 = vmatprep.subr.bf16.mxu1 %v1176_v16 }
  0x22   :  { %1111 = vmatpush3.bf16.msra.mxu1 %v1176_v16 }
  0xd9   :  { %v1082_v23 = vpop.f32.mrb[0].mxu0 }
  0xda   :  { %v1421_v24 = vadd.f32 %v1082_v23, %v1418_v22  ;;  %v156_v25 = vpop.f32.mrb[1].mxu0 }
  0xdb   :  { %v1424_v26 = vadd.f32 %v156_v25, %v1418_v22  ;;  %v1083_v27 = vpop.f32.mrb[2].mxu0 }
  0xdc   :  { %v912_v28 = vmul.f32 -1.442695, %v1421_v24  ;;  %v1428_v29 = vadd.f32 %v1083_v27, %v1418_v22  ;;  %v159_v30 = vpop.f32.mrb[3].mxu0 }
  0xdd   :  { %v910_v31 = vmul.f32 -1.442695, %v1424_v26  ;;  %v1432_v32 = vadd.f32 %v159_v30, %v1418_v22 }
  0xde   :  { %1185 = vpow2.f32 %v912_v28  ;;  %v913_v33 = vmul.f32 -1.442695, %v1428_v29 }
  0xdf   :  { %1187 = vpow2.f32 %v910_v31  ;;  %v911_v34 = vmul.f32 -1.442695, %v1432_v32 }
  0xe0   :  { %1189 = vpow2.f32 %v913_v33 }
  0xe1   :  { %1191 = vpow2.f32 %v911_v34  ;;  %v1086_v35 = vpop.f32.mrb[4].mxu0 }
  0xe2   :  { %v1437_v36 = vadd.f32 %v1086_v35, %v1418_v22  ;;  %v172_v37 = vpop.f32.mrb[5].mxu0 }
  0xe3   :  { %v1440_v38 = vadd.f32 %v172_v37, %v1418_v22  ;;  %v1087_v39 = vpop.f32.mrb[6].mxu0 }
  0xe4   :  { %v916_v40 = vmul.f32 -1.442695, %v1437_v36  ;;  %v1444_v41 = vadd.f32 %v1087_v39, %v1418_v22  ;;  %v175_v42 = vpop.f32.mrb[7].mxu0 }
  0xe5   :  { %v914_v43 = vmul.f32 -1.442695, %v1440_v38  ;;  %v1448_v44 = vadd.f32 %v175_v42, %v1418_v22 }
  0xe6   :  { %1193 = vpow2.f32 %v916_v40  ;;  %v917_v45 = vmul.f32 -1.442695, %v1444_v41 }
  0xe7   :  { %1195 = vpow2.f32 %v914_v43  ;;  %v915_v46 = vmul.f32 -1.442695, %v1448_v44 }
  0xe8   :  { %v1186_v47 = vpop.eup %1185  ;;  %1197 = vpow2.f32 %v917_v45 }
  0xe9   :  { %v1188_v48 = vpop.eup %1187  ;;  %v269_v49 = vadd.f32 1.0, %v1186_v47  ;;  %1199 = vpow2.f32 %v915_v46  ;;  %v1090_v50 = vpop.f32.mrb[8].mxu0 }
  0xea   :  { %v1190_v51 = vpop.eup %1189  ;;  %v267_v52 = vadd.f32 1.0, %v1188_v48  ;;  %v1453_v53 = vadd.f32 %v1090_v50, %v1418_v22  ;;  %v188_v54 = vpop.f32.mrb[9].mxu0 }
  0xeb   :  { %v1192_v55 = vpop.eup %1191  ;;  %1201 = vrcp.f32 %v269_v49  ;;  %v270_v56 = vadd.f32 1.0, %v1190_v51  ;;  %v1456_v57 = vadd.f32 %v188_v54, %v1418_v22  ;;  %v1091_v58 = vpop.f32.mrb[10].mxu0 }
  0xec   :  { %1203 = vrcp.f32 %v267_v52  ;;  %v268_v59 = vadd.f32 1.0, %v1192_v55  ;;  %v920_v60 = vmul.f32 -1.442695, %v1453_v53  ;;  %v1460_v61 = vadd.f32 %v1091_v58, %v1418_v22  ;;  %v191_v62 = vpop.f32.mrb[11].mxu0 }
  0xed   :  { %1205 = vrcp.f32 %v270_v56  ;;  %v918_v63 = vmul.f32 -1.442695, %v1456_v57  ;;  %v1464_v0 = vadd.f32 %v191_v62, %v1418_v22 }
  0xee   :  { %1207 = vrcp.f32 %v268_v59  ;;  %v921_v1 = vmul.f32 -1.442695, %v1460_v61 }
  0xef   :  { %1209 = vpow2.f32 %v920_v60  ;;  %v919_v2 = vmul.f32 -1.442695, %v1464_v0 }
  0xf0   :  { %v1194_v3 = vpop.eup %1193  ;;  %1211 = vpow2.f32 %v918_v63 }
  0xf1   :  { %v1196_v4 = vpop.eup %1195  ;;  %v273_v5 = vadd.f32 1.0, %v1194_v3  ;;  %1213 = vpow2.f32 %v921_v1  ;;  %v1094_v6 = vpop.f32.mrb[12].mxu0 }
  0xf2   :  { %v1198_v7 = vpop.eup %1197  ;;  %v271_v8 = vadd.f32 1.0, %v1196_v4  ;;  %1215 = vpow2.f32 %v919_v2  ;;  %v1469_v9 = vadd.f32 %v1094_v6, %v1418_v22  ;;  %v204_v10 = vpop.f32.mrb[13].mxu0 }
  0xf3   :  { %v1200_v11 = vpop.eup %1199  ;;  %1217 = vrcp.f32 %v273_v5  ;;  %v274_v12 = vadd.f32 1.0, %v1198_v7  ;;  %v1472_v13 = vadd.f32 %v204_v10, %v1418_v22  ;;  %v1095_v14 = vpop.f32.mrb[14].mxu0 }
  0xf4   :  { %1219 = vrcp.f32 %v271_v8  ;;  %v272_v15 = vadd.f32 1.0, %v1200_v11  ;;  %v924_v16 = vmul.f32 -1.442695, %v1469_v9  ;;  %v1476_v17 = vadd.f32 %v1095_v14, %v1418_v22  ;;  %v207_v18 = vpop.f32.mrb[15].mxu0 }
  0xf5   :  { %v1202_v19 = vpop.eup %1201  ;;  %1221 = vrcp.f32 %v274_v12  ;;  %v922_v20 = vmul.f32 -1.442695, %v1472_v13  ;;  %v1480_v23 = vadd.f32 %v207_v18, %v1418_v22 }
  0xf6   :  { %v1204_v25 = vpop.eup %1203  ;;  %1223 = vrcp.f32 %v272_v15  ;;  %v925_v27 = vmul.f32 -1.442695, %v1476_v17  ;;  %v317_v33 = vmul.f32 %v1202_v19, %v1421_v24 }
  0xf7   :  { %v1206_v28 = vpop.eup %1205  ;;  %1225 = vpow2.f32 %v924_v16  ;;  %v923_v30 = vmul.f32 -1.442695, %v1480_v23  ;;  %v315_v37 = vmul.f32 %v1204_v25, %v1424_v26  ;;  %v1183_v25 = vld [vmem:[%s1642_s5 + $0x30] sm:$0xff]  }
  0xf8   :  { %v1208_v31 = vpop.eup %1207  ;;  %v318_v34 = vmul.f32 %v1206_v28, %v1428_v29  ;;  %1227 = vpow2.f32 %v922_v20  ;;  %v1181_v20 = vld [vmem:[%s1642_s5 + $0x20] sm:$0xff]  }
  0xf9   :  { %v1210_v35 = vpop.eup %1209  ;;  %1229 = vpow2.f32 %v925_v27  ;;  %v316_v22 = vmul.f32 %v1208_v31, %v1432_v32  ;;  %v1184_v27 = vld [vmem:[%s1642_s5 + $0x38] sm:$0xff]   ;;  %v371_v28 = vld [vmem:[%s1643_s4] sm:$0x1] }
  0xfa   :  { %v1212_v39 = vpop.eup %1211  ;;  %v277_v40 = vadd.f32 1.0, %v1210_v35  ;;  %1231 = vpow2.f32 %v923_v30  ;;  %v332_v42 = vpack.c.bf16 %v318_v34, %v317_v33  ;;  %v372_v30 = vunpack.c.l.bf16 %v371_v28 }
  0xfb   :  { %v1214_v43 = vpop.eup %1213  ;;  %v275_v45 = vadd.f32 1.0, %v1212_v39  ;;  %v331_v46 = vpack.c.bf16 %v316_v22, %v315_v37 }
  0xfc   :  { %v1216_v47 = vpop.eup %1215  ;;  %1233 = vrcp.f32 %v277_v40  ;;  %v278_v48 = vadd.f32 1.0, %v1214_v43  ;;  %v1528_v31 = vrot.slane %v372_v30, %v1415_v21 }
  0xfd   :  { %v1218_v24 = vpop.eup %1217  ;;  %1235 = vrcp.f32 %v275_v45  ;;  %v276_v29 = vadd.f32 1.0, %v1216_v47  ;;  %1112 = vmatprep.mubr.bf16.mxu1 %v331_v46 }
  0xfe   :  { %v1220_v49 = vpop.eup %1219  ;;  %1237 = vrcp.f32 %v278_v48  ;;  %1113 = vmatmul.mubr.bf16.vlgmr.msra.gmra.mrb[0].mxu1 %v332_v42  ;;  %v321_v50 = vmul.f32 %v1218_v24, %v1437_v36 }
  0xff   :  { %v1222_v26 = vpop.eup %1221  ;;  %1239 = vrcp.f32 %v276_v29  ;;  %v319_v54 = vmul.f32 %v1220_v49, %v1440_v38 }
 0x100   :  { %v1224_v32 = vpop.eup %1223  ;;  %v322_v51 = vmul.f32 %v1222_v26, %v1444_v41 }
 0x101   :  { %v1226_v52 = vpop.eup %1225  ;;  %v320_v55 = vmul.f32 %v1224_v32, %v1448_v44 }
 0x102   :  { %v1228_v56 = vpop.eup %1227  ;;  %v281_v58 = vadd.f32 1.0, %v1226_v52  ;;  %v334_v59 = vpack.c.bf16 %v322_v51, %v321_v50 }
 0x103   :  { %v1230_v60 = vpop.eup %1229  ;;  %v279_v62 = vadd.f32 1.0, %v1228_v56  ;;  %v333_v63 = vpack.c.bf16 %v320_v55, %v319_v54 }
 0x104   :  { %v1232_v1 = vpop.eup %1231  ;;  %1241 = vrcp.f32 %v281_v58  ;;  %v282_v2 = vadd.f32 1.0, %v1230_v60 }
 0x105   :  { %1243 = vrcp.f32 %v279_v62  ;;  %v280_v3 = vadd.f32 1.0, %v1232_v1  ;;  %1116 = vmatprep.mubr.bf16.mxu1 %v333_v63 }
 0x106   :  { %v1234_v36 = vpop.eup %1233  ;;  %1245 = vrcp.f32 %v282_v2  ;;  %1117 = vmatmul.mubr.bf16.gmra.mrb[4].mxu1 %v334_v59 }
 0x107   :  { %v1236_v41 = vpop.eup %1235  ;;  %1247 = vrcp.f32 %v280_v3  ;;  %v325_v44 = vmul.f32 %v1234_v36, %v1453_v53 }
 0x108   :  { %v1238_v38 = vpop.eup %1237  ;;  %v323_v6 = vmul.f32 %v1236_v41, %v1456_v57 }
 0x109   :  { %v1240_v4 = vpop.eup %1239  ;;  %v326_v5 = vmul.f32 %v1238_v38, %v1460_v61 }
 0x10a   :  { %v324_v7 = vmul.f32 %v1240_v4, %v1464_v0  ;;  %v1177_v0 = vld [vmem:[%s1642_s5] sm:$0xff]  }
 0x10b   :  { %v336_v8 = vpack.c.bf16 %v326_v5, %v325_v44  ;;  %1128 = vmatprep.subr.bf16.mxu0 %v1177_v0 }
 0x10c   :  { %v335_v10 = vpack.c.bf16 %v324_v7, %v323_v6  ;;  %1129 = vmatpush3.bf16.msra.mxu0 %v1177_v0 }
 0x10e   :  { %v1242_v11 = vpop.eup %1241  ;;  %1120 = vmatprep.mubr.bf16.mxu1 %v335_v10 }
 0x10f   :  { %v1244_v12 = vpop.eup %1243  ;;  %1121 = vmatmul.mubr.bf16.gmra.mrb[8].mxu1 %v336_v8  ;;  %v329_v16 = vmul.f32 %v1242_v11, %v1469_v9  ;;  %v1178_v9 = vld [vmem:[%s1642_s5 + $0x8] sm:$0xff]  }
 0x110   :  { %v1246_v14 = vpop.eup %1245  ;;  %v327_v53 = vmul.f32 %v1244_v12, %v1472_v13  ;;  %1130 = vmatprep.subr.bf16.mxu0 %v1178_v9  ;;  %v1179_v13 = vld [vmem:[%s1642_s5 + $0x10] sm:$0xff]  }
 0x111   :  { %v1248_v15 = vpop.eup %1247  ;;  %v330_v18 = vmul.f32 %v1246_v14, %v1476_v17  ;;  %1131 = vmatpush3.bf16.msra.mxu0 %v1178_v9  ;;  %v1180_v17 = vld [vmem:[%s1642_s5 + $0x18] sm:$0xff]  }
 0x112   :  { %v328_v61 = vmul.f32 %v1248_v15, %v1480_v23  ;;  %1132 = vmatprep.subr.bf16.mxu0 %v1179_v13  ;;  %v1182_v23 = vld [vmem:[%s1642_s5 + $0x28] sm:$0xff]  }
 0x113   :  { %v338_v19 = vpack.c.bf16 %v330_v18, %v329_v16 }
 0x114   :  { %v337_v57 = vpack.c.bf16 %v328_v61, %v327_v53 }
 0x115   :  { %1133 = vmatpush3.bf16.msra.mxu0 %v1179_v13 }
 0x116   :  { %1124 = vmatprep.mubr.bf16.mxu1 %v337_v57  ;;  %1134 = vmatprep.subr.bf16.mxu0 %v1180_v17 }
 0x117   :  { %1125 = vmatmul.mubr.bf16.gmra.mrb[12].mxu1 %v338_v19 }
 0x119   :  { %1135 = vmatpush3.bf16.msra.mxu0 %v1180_v17 }
 0x11a   :  { %1136 = vmatprep.subr.bf16.mxu0 %v1181_v20 }
 0x11d   :  { %1137 = vmatpush3.bf16.msra.mxu0 %v1181_v20 }
 0x11e   :  { %1138 = vmatprep.subr.bf16.mxu0 %v1182_v23 }
 0x121   :  { %1139 = vmatpush3.bf16.msra.mxu0 %v1182_v23 }
 0x122   :  { %1140 = vmatprep.subr.bf16.mxu0 %v1183_v25 }
 0x125   :  { %1141 = vmatpush3.bf16.msra.mxu0 %v1183_v25 }
 0x126   :  { %1142 = vmatprep.subr.bf16.mxu0 %v1184_v27 }
 0x129   :  { %1143 = vmatpush3.bf16.msra.mxu0 %v1184_v27 }
 0x1d1   :  { %v1114_v33 = vpop.f32.mrb[0].mxu1 }
 0x1d2   :  { %v1531_v34 = vadd.f32 %v1114_v33, %v1528_v31  ;;  %v459_v35 = vpop.f32.mrb[1].mxu1 }
 0x1d3   :  { %v1534_v37 = vadd.f32 %v459_v35, %v1528_v31  ;;  %v1115_v22 = vpop.f32.mrb[2].mxu1 }
 0x1d4   :  { %v936_v39 = vmul.f32 -1.442695, %v1531_v34  ;;  %v1538_v40 = vadd.f32 %v1115_v22, %v1528_v31  ;;  %v462_v42 = vpop.f32.mrb[3].mxu1 }
 0x1d5   :  { %v934_v43 = vmul.f32 -1.442695, %v1534_v37  ;;  %v1542_v45 = vadd.f32 %v462_v42, %v1528_v31 }
 0x1d6   :  { %1249 = vpow2.f32 %v936_v39  ;;  %v937_v46 = vmul.f32 -1.442695, %v1538_v40 }
 0x1d7   :  { %1251 = vpow2.f32 %v934_v43  ;;  %v935_v47 = vmul.f32 -1.442695, %v1542_v45 }
 0x1d8   :  { %1253 = vpow2.f32 %v937_v46 }
 0x1d9   :  { %1255 = vpow2.f32 %v935_v47  ;;  %v1118_v48 = vpop.f32.mrb[4].mxu1 }
 0x1da   :  { %v1547_v24 = vadd.f32 %v1118_v48, %v1528_v31  ;;  %v475_v29 = vpop.f32.mrb[5].mxu1 }
 0x1db   :  { %v1550_v49 = vadd.f32 %v475_v29, %v1528_v31  ;;  %v1119_v26 = vpop.f32.mrb[6].mxu1 }
 0x1dc   :  { %v940_v32 = vmul.f32 -1.442695, %v1547_v24  ;;  %v1554_v50 = vadd.f32 %v1119_v26, %v1528_v31  ;;  %v478_v51 = vpop.f32.mrb[7].mxu1 }
 0x1dd   :  { %v938_v52 = vmul.f32 -1.442695, %v1550_v49  ;;  %v1558_v54 = vadd.f32 %v478_v51, %v1528_v31 }
 0x1de   :  { %1257 = vpow2.f32 %v940_v32  ;;  %v941_v55 = vmul.f32 -1.442695, %v1554_v50 }
 0x1df   :  { %1259 = vpow2.f32 %v938_v52  ;;  %v939_v56 = vmul.f32 -1.442695, %v1558_v54 }
 0x1e0   :  { %v1250_v58 = vpop.eup %1249  ;;  %1261 = vpow2.f32 %v941_v55 }
 0x1e1   :  { %v1252_v59 = vpop.eup %1251  ;;  %v572_v60 = vadd.f32 1.0, %v1250_v58  ;;  %1263 = vpow2.f32 %v939_v56 }
 0x1e2   :  { %v1254_v62 = vpop.eup %1253  ;;  %v570_v63 = vadd.f32 1.0, %v1252_v59  ;;  %v1122_v1 = vpop.f32.mrb[8].mxu1 }
 0x1e3   :  { %v1256_v2 = vpop.eup %1255  ;;  %1265 = vrcp.f32 %v572_v60  ;;  %v573_v3 = vadd.f32 1.0, %v1254_v62  ;;  %v1563_v36 = vadd.f32 %v1122_v1, %v1528_v31  ;;  %v491_v41 = vpop.f32.mrb[9].mxu1 }
 0x1e4   :  { %1267 = vrcp.f32 %v570_v63  ;;  %v571_v38 = vadd.f32 1.0, %v1256_v2  ;;  %v1566_v4 = vadd.f32 %v491_v41, %v1528_v31  ;;  %v1123_v44 = vpop.f32.mrb[10].mxu1 }
 0x1e5   :  { %1269 = vrcp.f32 %v573_v3  ;;  %v944_v5 = vmul.f32 -1.442695, %v1563_v36  ;;  %v1570_v6 = vadd.f32 %v1123_v44, %v1528_v31  ;;  %v494_v7 = vpop.f32.mrb[11].mxu1 }
 0x1e6   :  { %1271 = vrcp.f32 %v571_v38  ;;  %v942_v8 = vmul.f32 -1.442695, %v1566_v4  ;;  %v1574_v10 = vadd.f32 %v494_v7, %v1528_v31 }
 0x1e7   :  { %1273 = vpow2.f32 %v944_v5  ;;  %v945_v11 = vmul.f32 -1.442695, %v1570_v6 }
 0x1e8   :  { %v1258_v12 = vpop.eup %1257  ;;  %1275 = vpow2.f32 %v942_v8  ;;  %v943_v14 = vmul.f32 -1.442695, %v1574_v10 }
 0x1e9   :  { %v1260_v15 = vpop.eup %1259  ;;  %v576_v16 = vadd.f32 1.0, %v1258_v12  ;;  %1277 = vpow2.f32 %v945_v11 }
 0x1ea   :  { %v1262_v18 = vpop.eup %1261  ;;  %v574_v53 = vadd.f32 1.0, %v1260_v15  ;;  %1279 = vpow2.f32 %v943_v14  ;;  %v1126_v61 = vpop.f32.mrb[12].mxu1 }
 0x1eb   :  { %v1264_v19 = vpop.eup %1263  ;;  %1281 = vrcp.f32 %v576_v16  ;;  %v577_v57 = vadd.f32 1.0, %v1262_v18  ;;  %v1579_v0 = vadd.f32 %v1126_v61, %v1528_v31  ;;  %v507_v9 = vpop.f32.mrb[13].mxu1 }
 0x1ec   :  { %1283 = vrcp.f32 %v574_v53  ;;  %v575_v13 = vadd.f32 1.0, %v1264_v19  ;;  %v1582_v17 = vadd.f32 %v507_v9, %v1528_v31  ;;  %v1127_v20 = vpop.f32.mrb[14].mxu1 }
 0x1ed   :  { %v1266_v23 = vpop.eup %1265  ;;  %1285 = vrcp.f32 %v577_v57  ;;  %v948_v25 = vmul.f32 -1.442695, %v1579_v0  ;;  %v1586_v27 = vadd.f32 %v1127_v20, %v1528_v31  ;;  %v510_v28 = vpop.f32.mrb[15].mxu1 }
 0x1ee   :  { %v1268_v30 = vpop.eup %1267  ;;  %1287 = vrcp.f32 %v575_v13  ;;  %v946_v33 = vmul.f32 -1.442695, %v1582_v17  ;;  %v1590_v35 = vadd.f32 %v510_v28, %v1528_v31  ;;  %v620_v43 = vmul.f32 %v1266_v23, %v1531_v34 }
 0x1ef   :  { %v1270_v22 = vpop.eup %1269  ;;  %1289 = vpow2.f32 %v948_v25  ;;  %v949_v39 = vmul.f32 -1.442695, %v1586_v27  ;;  %v618_v29 = vmul.f32 %v1268_v30, %v1534_v37 }
 0x1f0   :  { %v1272_v42 = vpop.eup %1271  ;;  %v621_v46 = vmul.f32 %v1270_v22, %v1538_v40  ;;  %1291 = vpow2.f32 %v946_v33  ;;  %v947_v47 = vmul.f32 -1.442695, %v1590_v35 }
 0x1f1   :  { %v1274_v48 = vpop.eup %1273  ;;  %v619_v26 = vmul.f32 %v1272_v42, %v1542_v45  ;;  %1293 = vpow2.f32 %v949_v39 }
 0x1f2   :  { %v1276_v31 = vpop.eup %1275  ;;  %v635_v32 = vpack.c.bf16 %v621_v46, %v620_v43  ;;  %v580_v51 = vadd.f32 1.0, %v1274_v48  ;;  %1295 = vpow2.f32 %v947_v47 }
 0x1f3   :  { %v1278_v52 = vpop.eup %1277  ;;  %v578_v55 = vadd.f32 1.0, %v1276_v31  ;;  %v634_v56 = vpack.c.bf16 %v619_v26, %v618_v29 }
 0x1f4   :  { %v1280_v58 = vpop.eup %1279  ;;  %1297 = vrcp.f32 %v580_v51  ;;  %v581_v34 = vadd.f32 1.0, %v1278_v52 }
 0x1f5   :  { %v1282_v40 = vpop.eup %1281  ;;  %1299 = vrcp.f32 %v578_v55  ;;  %v579_v59 = vadd.f32 1.0, %v1280_v58  ;;  %1144 = vmatprep.mubr.bf16.mxu0 %v634_v56 }
 0x1f6   :  { %v1284_v60 = vpop.eup %1283  ;;  %1301 = vrcp.f32 %v581_v34  ;;  %1145 = vmatmul.mubr.bf16.vlgmr.msra.gmra.mrb[16].mxu0 %v635_v32  ;;  %v624_v62 = vmul.f32 %v1282_v40, %v1547_v24 }
 0x1f7   :  { %v1286_v37 = vpop.eup %1285  ;;  %1303 = vrcp.f32 %v579_v59  ;;  %v622_v2 = vmul.f32 %v1284_v60, %v1550_v49 }
 0x1f8   :  { %v1288_v45 = vpop.eup %1287  ;;  %v625_v63 = vmul.f32 %v1286_v37, %v1554_v50 }
 0x1f9   :  { %v1290_v1 = vpop.eup %1289  ;;  %v623_v3 = vmul.f32 %v1288_v45, %v1558_v54 }
 0x1fa   :  { %v1292_v41 = vpop.eup %1291  ;;  %v584_v38 = vadd.f32 1.0, %v1290_v1  ;;  %v637_v44 = vpack.c.bf16 %v625_v63, %v624_v62 }
 0x1fb   :  { %v1294_v5 = vpop.eup %1293  ;;  %v582_v7 = vadd.f32 1.0, %v1292_v41  ;;  %v636_v8 = vpack.c.bf16 %v623_v3, %v622_v2 }
 0x1fc   :  { %v1296_v11 = vpop.eup %1295  ;;  %1305 = vrcp.f32 %v584_v38  ;;  %v585_v12 = vadd.f32 1.0, %v1294_v5 }
 0x1fd   :  { %1307 = vrcp.f32 %v582_v7  ;;  %v583_v14 = vadd.f32 1.0, %v1296_v11  ;;  %1148 = vmatprep.mubr.bf16.mxu0 %v636_v8 }
 0x1fe   :  { %v1298_v24 = vpop.eup %1297  ;;  %1309 = vrcp.f32 %v585_v12  ;;  %1149 = vmatmul.mubr.bf16.gmra.mrb[20].mxu0 %v637_v44 }
 0x1ff   :  { %v1300_v50 = vpop.eup %1299  ;;  %1311 = vrcp.f32 %v583_v14  ;;  %v628_v54 = vmul.f32 %v1298_v24, %v1563_v36 }
 0x200   :  { %v1302_v49 = vpop.eup %1301  ;;  %v626_v18 = vmul.f32 %v1300_v50, %v1566_v4 }
 0x201   :  { %v1304_v15 = vpop.eup %1303  ;;  %v629_v16 = vmul.f32 %v1302_v49, %v1570_v6 }
 0x202   :  { %v627_v53 = vmul.f32 %v1304_v15, %v1574_v10  ;;  %v658_v10 = vld [vmem:[%s1644_s6] sm:$0x1] }
 0x203   :  { %v639_v61 = vpack.c.bf16 %v629_v16, %v628_v54  ;;  %v659_v30 = vunpack.c.l.bf16 %v658_v10 }
 0x204   :  { %v638_v19 = vpack.c.bf16 %v627_v53, %v626_v18 }
 0x205   :  { %v663_v33 = vrot.slane %v659_v30, %v1415_v21 }
 0x206   :  { %v1306_v57 = vpop.eup %1305  ;;  %1152 = vmatprep.mubr.bf16.mxu0 %v638_v19 }
 0x207   :  { %v1308_v9 = vpop.eup %1307  ;;  %1153 = vmatmul.mubr.bf16.gmra.mrb[24].mxu0 %v639_v61  ;;  %v632_v23 = vmul.f32 %v1306_v57, %v1579_v0 }
 0x208   :  { %v1310_v13 = vpop.eup %1309  ;;  %v630_v36 = vmul.f32 %v1308_v9, %v1582_v17 }
 0x209   :  { %v1312_v20 = vpop.eup %1311  ;;  %v633_v25 = vmul.f32 %v1310_v13, %v1586_v27 }
 0x20a   :  { %v631_v6 = vmul.f32 %v1312_v20, %v1590_v35 }
 0x20b   :  { %v641_v28 = vpack.c.bf16 %v633_v25, %v632_v23 }
 0x20c   :  { %v640_v4 = vpack.c.bf16 %v631_v6, %v630_v36 }
 0x20e   :  { %1156 = vmatprep.mubr.bf16.mxu0 %v640_v4 }
 0x20f   :  { %1157 = vmatmul.mubr.bf16.gmra.mrb[28].mxu0 %v641_v28 }
 0x2c9   :  { %v1146_v22 = vpop.f32.mrb[16].mxu0 }
 0x2ca   :  { %v746_v39 = vpop.f32.mrb[17].mxu0  ;;  %v755_v42 = vadd.f32 %v1146_v22, %v663_v33 }
 0x2cb   :  { %v1147_v0 = vpop.f32.mrb[18].mxu0  ;;  %v747_v17 = vadd.f32 %v746_v39, %v663_v33 }
 0x2cc   :  { %v758_v27 = vadd.f32 %v1147_v0, %v663_v33  ;;  %v749_v43 = vpop.f32.mrb[19].mxu0 }
 0x2cd   :  { %v750_v46 = vadd.f32 %v749_v43, %v663_v33 }
 0x2ce   :  { %v998_v35 = vpack.c.bf16 %v758_v27, %v755_v42 }
 0x2cf   :  { %v993_v47 = vpack.c.bf16 %v750_v46, %v747_v17 }
 0x2d0   :  { %1030 = vst [vmem:[%s1645_s7 + $0x8] sm:$0xff] %v998_v35  }
 0x2d1   :  { %994 = vst [vmem:[%s1645_s7] sm:$0xff] %v993_v47   ;;  %v1150_v48 = vpop.f32.mrb[20].mxu0 }
 0x2d2   :  { %v762_v21 = vpop.f32.mrb[21].mxu0  ;;  %v771_v26 = vadd.f32 %v1150_v48, %v663_v33 }
 0x2d3   :  { %v1151_v29 = vpop.f32.mrb[22].mxu0  ;;  %v763_v51 = vadd.f32 %v762_v21, %v663_v33 }
 0x2d4   :  { %v774_v31 = vadd.f32 %v1151_v29, %v663_v33  ;;  %v765_v32 = vpop.f32.mrb[23].mxu0 }
 0x2d5   :  { %v766_v52 = vadd.f32 %v765_v32, %v663_v33 }
 0x2d6   :  { %v1008_v55 = vpack.c.bf16 %v774_v31, %v771_v26 }
 0x2d7   :  { %v1003_v56 = vpack.c.bf16 %v766_v52, %v763_v51 }
 0x2d8   :  { %1032 = vst [vmem:[%s1645_s7 + $0x18] sm:$0xff] %v1008_v55  }
 0x2d9   :  { %1031 = vst [vmem:[%s1645_s7 + $0x10] sm:$0xff] %v1003_v56  }
 0x2da   :  { %v1154_v58 = vpop.f32.mrb[24].mxu0 }
 0x2db   :  { %v778_v34 = vpop.f32.mrb[25].mxu0  ;;  %v787_v59 = vadd.f32 %v1154_v58, %v663_v33 }
 0x2dc   :  { %v1155_v40 = vpop.f32.mrb[26].mxu0  ;;  %v779_v45 = vadd.f32 %v778_v34, %v663_v33 }
 0x2dd   :  { %v790_v60 = vadd.f32 %v1155_v40, %v663_v33  ;;  %v781_v37 = vpop.f32.mrb[27].mxu0 }
 0x2de   :  { %v782_v62 = vadd.f32 %v781_v37, %v663_v33 }
 0x2df   :  { %v1018_v63 = vpack.c.bf16 %v790_v60, %v787_v59 }
 0x2e0   :  { %v1013_v1 = vpack.c.bf16 %v782_v62, %v779_v45 }
 0x2e1   :  { %1034 = vst [vmem:[%s1645_s7 + $0x28] sm:$0xff] %v1018_v63  }
 0x2e2   :  { %1033 = vst [vmem:[%s1645_s7 + $0x20] sm:$0xff] %v1013_v1   ;;  %v1158_v2 = vpop.f32.mrb[28].mxu0 }
 0x2e3   :  { %v794_v3 = vpop.f32.mrb[29].mxu0  ;;  %v803_v38 = vadd.f32 %v1158_v2, %v663_v33 }
 0x2e4   :  { %v1159_v41 = vpop.f32.mrb[30].mxu0  ;;  %v795_v7 = vadd.f32 %v794_v3, %v663_v33 }
 0x2e5   :  { %v806_v44 = vadd.f32 %v1159_v41, %v663_v33  ;;  %v797_v5 = vpop.f32.mrb[31].mxu0 }
 0x2e6   :  { %v798_v8 = vadd.f32 %v797_v5, %v663_v33 }
 0x2e7   :  { %v1028_v11 = vpack.c.bf16 %v806_v44, %v803_v38 }
 0x2e8   :  { %v1023_v12 = vpack.c.bf16 %v798_v8, %v795_v7 }
 0x2e9   :  { %1036 = vst [vmem:[%s1645_s7 + $0x38] sm:$0xff] %v1028_v11  }
 0x2ea   :  { %1035 = vst [vmem:[%s1645_s7 + $0x30] sm:$0xff] %v1023_v12  }

</bundles_post_ra>
